<compile_context>
chip_gen: v7x
topology: tpu7x:2x2x1
jax: 0.10.0
libtpu: 0.0.40
codegen_flags: <defaults>
</compile_context>

<pallas_src>
import functools

import jax
import jax.numpy as jnp
from jax import lax
from jax.experimental import pallas as pl
from jax.experimental.pallas import tpu as pltpu


def _decoder_prob_kernel(inv_num_tags, h_ref, w_ref, b_ref, mask_ref, prob_ref):
    # h: [TM, H] native dtype; w: [H, T] native dtype; b: [1, T] f32
    # mask: [TM, 1] f32
    logits = jnp.dot(h_ref[...], w_ref[...],
                     preferred_element_type=jnp.float32)
    logits = logits + b_ref[...]                          # [TM, T] f32

    # numerically-stable softmax over the tag dim
    m = jnp.max(logits, axis=-1, keepdims=True)           # [TM, 1]
    e = jnp.exp(logits - m)                               # [TM, T]
    s = jnp.sum(e, axis=-1, keepdims=True)                # [TM, 1]
    p = e * pl.reciprocal(s, approx=True)                 # EUP recip, VPU mul

    # Torch adds (1-mask)*-1e32 to every tag of a masked row; after f32
    # absorption that row's softmax is exactly uniform -> cheap row select.
    prob_ref[...] = jnp.where(mask_ref[...] > 0.0, p,
                              jnp.float32(inv_num_tags)).astype(prob_ref.dtype)


def _decoder_loss_kernel(pad_id, inv_num_tags, h_ref, w_ref, b_ref, packed_ref,
                         prob_ref, losssum_ref):
    # packed: [TM, 1] int32 = label*2 + mask_bit  (single ancillary column)
    logits = jnp.dot(h_ref[...], w_ref[...],
                     preferred_element_type=jnp.float32)
    logits = logits + b_ref[...]                          # [TM, T] f32

    m = jnp.max(logits, axis=-1, keepdims=True)
    e = jnp.exp(logits - m)
    s = jnp.sum(e, axis=-1, keepdims=True)
    p = e * pl.reciprocal(s, approx=True)

    packed = packed_ref[...]                              # [TM, 1] int32, read once
    mask_bit = packed & 1                                 # 1 = real token
    lbl = packed >> 1                                     # label id (arith shift)

    prob_ref[...] = jnp.where(mask_bit > 0, p,
                              jnp.float32(inv_num_tags)).astype(prob_ref.dtype)

    # CrossEntropyLoss(ignore_index=pad_id): per-tile partial NLL sum.
    # (A per-row constant shift of the logits cancels in log_z - gold, so the
    # mask penalty is a mathematical no-op here; pad-labelled rows are dropped.
    # NOTE: rows with mask==0 but a non-pad label would diverge from Torch's
    # -1e32 absorption -- harmless under the "masked => label==pad_id" convention.)
    log_z = m + jnp.log(s)                                # [TM, 1]
    tm, t = logits.shape
    gold = jnp.sum(
        jnp.where(lbl == lax.broadcasted_iota(jnp.int32, (tm, t), 1),
                  logits, 0.0),
        axis=-1, keepdims=True)                           # [TM, 1]
    nll = log_z - gold                                    # [TM, 1]
    valid = lbl != pad_id                                 # [TM, 1] bool
    # where-guard (not nll*valid): the ragged final block may contain garbage
    # rows whose nll is Inf/NaN; select 0 before the reduce so they can't
    # poison the partial sum.
    losssum_ref[0, 0, 0] = jnp.sum(jnp.where(valid, nll, 0.0))


def _round_up(x, m):
    return ((x + m - 1) // m) * m


def tagging_fnn_decoder(hiddens, mask, weight, bias, labels=None, pad_id=0,
                        tile_m=1024, vmem_limit_bytes=32 * 1024 * 1024):
    """Forward pass of TaggingFNNDecoder.

    hiddens: [B, S, H] float (bf16 or f32 -- kept in native dtype)
    mask:    [B, S]    (1 = real token, 0 = pad)
    weight:  [num_tags, H]  (PyTorch nn.Linear layout)
    bias:    [num_tags]
    labels:  optional [B, S] int
    """
    B, S, H = hiddens.shape
    T = weight.shape[0]
    M = B * S
    dt = hiddens.dtype
    itemsize = jnp.dtype(dt).itemsize
    lane = 128

    # Sublane packing granule for the hiddens dtype: f32 -> 8, bf16 -> 16, int8 -> 32.
    granule = max(8, 32 // itemsize)

    # TM: largest granule multiple that (a) <= tile_m, (b) keeps the
    # double-buffered (TM,H) input + (TM,T) output + (TM,1) column tiles within
    # ~3/4 of the scoped-VMEM budget (safe for v7x's 64 MiB physical VMEM), and
    # (c) leaves >= 2 grid tiles when possible so the "parallel" grid axis can
    # shard across both v7x TensorCores.
    per_row = (2 * H * itemsize                         # hiddens tile (x2 buffers)
               + 2 * _round_up(T, lane) * itemsize      # prob tile, lane-padded
               + 2 * lane * 4)                          # (TM,1) column, lane-padded
    budget = (3 * vmem_limit_bytes) // 4
    tm_cap = max(granule, ((budget // per_row) // granule) * granule)
    TM = min(_round_up(tile_m, granule), tm_cap, _round_up(M, granule))
    if pl.cdiv(M, TM) < 2 and M >= 2 * granule:
        TM = min(TM, _round_up(pl.cdiv(M, 2), granule))
    G = pl.cdiv(M, TM)
    Mp = G * TM

    h2 = hiddens.reshape(M, H)                # NOT padded: ragged tail handled by Pallas
    wt = jnp.transpose(weight).astype(dt)     # [H, T] MXU-native dtype, resident in VMEM
    b2 = bias.reshape(1, T).astype(jnp.float32)

    h_spec = pl.BlockSpec((TM, H), lambda i: (i, 0))
    # TODO(synk): constant-index weight/bias could use pipeline_mode=pl.Buffered(1)
    # to drop their unused second buffer; skipped to keep lowering portable.
    w_spec = pl.BlockSpec((H, T), lambda i: (0, 0))       # resident across grid
    b_spec = pl.BlockSpec((1, T), lambda i: (0, 0))       # resident across grid
    col_spec = pl.BlockSpec((TM, 1), lambda i: (i, 0))
    prob_spec = pl.BlockSpec((TM, T), lambda i: (i, 0))
    # TODO(synk): for T < 128 the prob stores are masked (lane-sparse); padding
    # tags to 128 would make them lane-dense but inflates the write stream -- only
    # worth adopting after measurement, so not done here.

    params = pltpu.CompilerParams(
        dimension_semantics=("parallel",),                # shards tiles across v7x TCs
        vmem_limit_bytes=vmem_limit_bytes,
    )
    cost = pl.CostEstimate(
        flops=2 * M * H * T,
        transcendentals=M * T,                            # the exp in the softmax
        bytes_accessed=(M * H * itemsize                  # hiddens read
                        + H * T * itemsize                # weight read
                        + M * T * itemsize                # prob write
                        + M * 4),                         # mask/label column
    )

    if labels is None:
        # ---- probs-only variant: no label stream, no loss outputs ----
        m2 = mask.reshape(M, 1).astype(jnp.float32)       # ragged tail OK: garbage rows
        kernel = functools.partial(_decoder_prob_kernel, 1.0 / T)   # never written back
        prob = pl.pallas_call(
            kernel,
            out_shape=jax.ShapeDtypeStruct((M, T), dt),
            grid=(G,),
            in_specs=[h_spec, w_spec, b_spec, col_spec],
            out_specs=prob_spec,
            compiler_params=params,
            cost_estimate=cost,
        )(h2, wt, b2, m2)
        return (prob.reshape(B, S, T),)

    # ---- probs + loss variant ----
    lbl2 = labels.reshape(M, 1).astype(jnp.int32)
    m_bit = (mask.reshape(M, 1) > 0).astype(jnp.int32)
    packed = lbl2 * 2 + m_bit                             # one lane-sparse column, not two
    if Mp != M:
        # Tiny pad (4 bytes/row): pad rows get label=pad_id, mask=0, so they are
        # excluded from the loss; the big hidden stream is left unpadded.
        packed = jnp.pad(packed, ((0, Mp - M), (0, 0)), constant_values=2 * pad_id)

    kernel = functools.partial(_decoder_loss_kernel, pad_id, 1.0 / T)
    prob, loss_sum = pl.pallas_call(
        kernel,
        out_shape=(
            jax.ShapeDtypeStruct((M, T), dt),
            jax.ShapeDtypeStruct((G, 1, 1), jnp.float32),
        ),
        grid=(G,),
        in_specs=[h_spec, w_spec, b_spec, col_spec],
        out_specs=(
            prob_spec,
            pl.BlockSpec((1, 1, 1), lambda i: (i, 0, 0)),  # per-tile loss partials
        ),
        compiler_params=params,
        cost_estimate=cost,
    )(h2, wt, b2, packed)

    prob = prob.reshape(B, S, T)
    # CE denominator from the small labels array (no extra kernel output stream).
    denom = jnp.sum((labels != pad_id).astype(jnp.float32))
    # NOTE: if every label == pad_id this is 0/0 = NaN, matching
    # torch.nn.CrossEntropyLoss(reduction='mean') with all targets ignored.
    loss = jnp.sum(loss_sum) / denom
    return (prob, loss)


if __name__ == "__main__":
    # small shapes consistent with the module's forward
    B, S, H, NUM_TAGS, PAD_ID = 2, 8, 32, 16, 0

    key = jax.random.PRNGKey(0)
    k_h, k_w, k_b, k_l = jax.random.split(key, 4)

    # hiddens in bf16: native MXU operand, halves the dominant HBM stream
    hiddens = jax.random.normal(k_h, (B, S, H), dtype=jnp.float32).astype(jnp.bfloat16)

    # deterministic synthetic Linear(input_size=H, num_tags) parameters
    bound = 1.0 / (H ** 0.5)
    weight = jax.random.uniform(k_w, (NUM_TAGS, H), jnp.float32, -bound, bound)
    bias = jax.random.uniform(k_b, (NUM_TAGS,), jnp.float32, -bound, bound)

    # mask: first batch fully valid, second batch has 3 padded positions at the end
    mask = jnp.ones((B, S), dtype=jnp.float32)
    mask = mask.at[1, 5:].set(0.0)

    # labels in [1, NUM_TAGS); padded positions get PAD_ID (ignored by the loss)
    labels = jax.random.randint(k_l, (B, S), 1, NUM_TAGS, dtype=jnp.int32)
    labels = jnp.where(mask > 0, labels, PAD_ID)

    # inference path (probs only)
    (prob_inf,) = tagging_fnn_decoder(hiddens, mask, weight, bias, pad_id=PAD_ID)
    jax.block_until_ready(prob_inf)

    # training path (probs + loss)
    prob, loss = tagging_fnn_decoder(hiddens, mask, weight, bias,
                                     labels=labels, pad_id=PAD_ID)
    jax.block_until_ready(prob)
    jax.block_until_ready(loss)

    # ---- lightweight reference check (f32 math, weights quantized like the kernel) ----
    w_q = weight.astype(jnp.bfloat16).astype(jnp.float32)
    logits_ref = hiddens.astype(jnp.float32) @ w_q.T + bias
    logits_ref = logits_ref + (1.0 - mask)[..., None] * -1e32
    prob_ref = jax.nn.softmax(logits_ref, axis=-1)
    lg = logits_ref.reshape(-1, NUM_TAGS)
    lb = labels.reshape(-1)
    logz = jax.nn.logsumexp(lg, axis=-1)
    gold = jnp.take_along_axis(lg, lb[:, None], axis=-1)[:, 0]
    valid = lb != PAD_ID
    loss_ref = jnp.sum(jnp.where(valid, logz - gold, 0.0)) / jnp.sum(valid)

    assert prob.shape == (B, S, NUM_TAGS)
    assert prob_inf.shape == (B, S, NUM_TAGS)
    assert jnp.isfinite(loss)
    assert float(jnp.max(jnp.abs(prob.astype(jnp.float32) - prob_ref))) < 3e-2
    assert float(jnp.max(jnp.abs(prob_inf.astype(jnp.float32) - prob_ref))) < 3e-2
    assert float(jnp.abs(loss - loss_ref)) < 5e-2
    print("KERNEL_OK")
</pallas_src>

<mosaic_0001>
module attributes {stable_mosaic.version = 11 : i64} {
  func.func @_decoder_prob_kernel(%arg0: i32, %arg1: memref<16x32xbf16, #tpu.memory_space<vmem>>, %arg2: memref<32x16xbf16, #tpu.memory_space<vmem>>, %arg3: memref<1x16xf32, #tpu.memory_space<vmem>>, %arg4: memref<16x1xf32, #tpu.memory_space<vmem>>, %arg5: memref<16x16xbf16, #tpu.memory_space<vmem>>) attributes {dimension_semantics = [#tpu.dimension_semantics<parallel>], iteration_bounds = array<i64: 1>, scalar_prefetch = 0 : i64, scratch_operands = 0 : i64, tpu.core_type = #tpu.core_type<tc>, window_params = [{transform_indices = @transform_0, window_bounds = array<i64: 16, 32>}, {pipeline_mode = #tpu.pipeline_mode<synchronous>, transform_indices = @transform_1, window_bounds = array<i64: 32, 16>}, {pipeline_mode = #tpu.pipeline_mode<synchronous>, transform_indices = @transform_2, window_bounds = array<i64: 1, 16>}, {transform_indices = @transform_3, window_bounds = array<i64: 16, 1>}, {transform_indices = @transform_4, window_bounds = array<i64: 16, 16>}]} {
    %c0 = arith.constant 0 : index
    %c0_0 = arith.constant 0 : index
    %0 = vector.load %arg1[%c0, %c0_0] : memref<16x32xbf16, #tpu.memory_space<vmem>>, vector<16x32xbf16>
    %c0_1 = arith.constant 0 : index
    %c0_2 = arith.constant 0 : index
    %1 = vector.load %arg2[%c0_1, %c0_2] : memref<32x16xbf16, #tpu.memory_space<vmem>>, vector<32x16xbf16>
    %cst = arith.constant dense<0.000000e+00> : vector<16x16xf32>
    %2 = tpu.matmul %0, %1, %cst {dimension_numbers = #tpu.dot_dimension_numbers<[1], [0], [0], [1], [0, 0, 1, 1], [], []>} : vector<16x32xbf16>, vector<32x16xbf16>, vector<16x16xf32> -> vector<16x16xf32>
    %c0_3 = arith.constant 0 : index
    %c0_4 = arith.constant 0 : index
    %3 = vector.load %arg3[%c0_3, %c0_4] : memref<1x16xf32, #tpu.memory_space<vmem>>, vector<1x16xf32>
    %4 = vector.broadcast %3 : vector<1x16xf32> to vector<16x16xf32>
    %5 = arith.addf %2, %4 : vector<16x16xf32>
    %cst_5 = arith.constant dense<0xFF800000> : vector<16xf32>
    %6 = vector.multi_reduction <maximumf>, %5, %cst_5 [1] : vector<16x16xf32> to vector<16xf32>
    %7 = vector.shape_cast %6 : vector<16xf32> to vector<16x1xf32>
    %8 = vector.broadcast %7 : vector<16x1xf32> to vector<16x16xf32>
    %9 = arith.subf %5, %8 : vector<16x16xf32>
    %10 = math.exp %9 : vector<16x16xf32>
    %cst_6 = arith.constant dense<0.000000e+00> : vector<16xf32>
    %11 = vector.multi_reduction <add>, %10, %cst_6 [1] : vector<16x16xf32> to vector<16xf32>
    %12 = vector.shape_cast %11 : vector<16xf32> to vector<16x1xf32>
    %13 = tpu.reciprocal %12 {approx = true} : vector<16x1xf32> -> vector<16x1xf32>
    %14 = vector.broadcast %13 : vector<16x1xf32> to vector<16x16xf32>
    %15 = arith.mulf %10, %14 : vector<16x16xf32>
    %c0_7 = arith.constant 0 : index
    %c0_8 = arith.constant 0 : index
    %16 = vector.load %arg4[%c0_7, %c0_8] : memref<16x1xf32, #tpu.memory_space<vmem>>, vector<16x1xf32>
    %cst_9 = arith.constant 0.000000e+00 : f32
    %17 = vector.broadcast %cst_9 : f32 to vector<16x1xf32>
    %18 = arith.cmpf ogt, %16, %17 : vector<16x1xf32>
    %cst_10 = arith.constant 6.250000e-02 : f32
    %19 = vector.shape_cast %18 : vector<16x1xi1> to vector<16x1xi1>
    %20 = vector.broadcast %19 : vector<16x1xi1> to vector<16x16xi1>
    %21 = vector.broadcast %cst_10 : f32 to vector<16x16xf32>
    %22 = arith.select %20, %15, %21 : vector<16x16xi1>, vector<16x16xf32>
    %23 = arith.truncf %22 : vector<16x16xf32> to vector<16x16xbf16>
    %c0_11 = arith.constant 0 : index
    %c0_12 = arith.constant 0 : index
    %24 = vector.load %arg5[%c0_11, %c0_12] : memref<16x16xbf16, #tpu.memory_space<vmem>>, vector<16x16xbf16>
    tpu.vector_store %arg5[%c0_11, %c0_12], %23 {strides = array<i32>} : memref<16x16xbf16, #tpu.memory_space<vmem>>, vector<16x16xbf16>,
    return
  }
  func.func @transform_0(%arg0: i32) -> (i32, i32) {
    %c0_i32 = arith.constant 0 : i32
    %c0_i32_0 = arith.constant 0 : i32
    return %arg0, %c0_i32 : i32, i32
  }
  func.func @transform_1(%arg0: i32) -> (i32, i32) {
    %c0_i32 = arith.constant 0 : i32
    %c0_i32_0 = arith.constant 0 : i32
    %c0_i32_1 = arith.constant 0 : i32
    return %c0_i32, %c0_i32_0 : i32, i32
  }
  func.func @transform_2(%arg0: i32) -> (i32, i32) {
    %c0_i32 = arith.constant 0 : i32
    %c0_i32_0 = arith.constant 0 : i32
    %c0_i32_1 = arith.constant 0 : i32
    return %c0_i32, %c0_i32_0 : i32, i32
  }
  func.func @transform_3(%arg0: i32) -> (i32, i32) {
    %c0_i32 = arith.constant 0 : i32
    %c0_i32_0 = arith.constant 0 : i32
    return %arg0, %c0_i32 : i32, i32
  }
  func.func @transform_4(%arg0: i32) -> (i32, i32) {
    %c0_i32 = arith.constant 0 : i32
    %c0_i32_0 = arith.constant 0 : i32
    return %arg0, %c0_i32 : i32, i32
  }
}

</mosaic_0001>

<bundles_post_ra>
// kernel: tpu_custom_call.1
= control target key start
LH: loop header
LB: loop body
LE: loop exit
PB: predicated region body
PF: predicated region fallthrough
CT: control target
= control target key end

     0   :  { %v223_v1 = vmov 0.0   ;;  %vm224_vm0 = vmmov 0   ;;  %s288_s0 = inlined_call_operand.vmem [shape: bf16[16,32], index: 0, kind: input, shape index: {}]   ;;  %s289_s1 = inlined_call_operand.vmem [shape: bf16[32,16], index: 1, kind: input, shape index: {}]   ;;  %s290_s2 = inlined_call_operand.vmem [shape: f32[1,16], index: 2, kind: input, shape index: {}]   ;;  %s291_s3 = inlined_call_operand.vmem [shape: f32[16,1], index: 3, kind: input, shape index: {}]   ;;  %s292_s4 = inlined_call_operand.hbm [shape: bf16[16,16], index: 4, kind: output, shape index: {}]  }
   0x1   :  { %v188_v0 = vld [vmem:[%s289_s1] sm:$0xff]   ;;  %172 = vmatprep.subr.bf16.mxu0 %v223_v1  ;;  %v189_v2 = vld [vmem:[%s289_s1 + $0x8] sm:$0xff]   ;;  %176 = vmatprep.mubr.msk.bf16.mxu0 %vm224_vm0, %v223_v1 }
   0x2   :  { %173 = vmatpush3.bf16.msra.mxu0 %v188_v0 }
   0x3   :  { %174 = vmatprep.subr.bf16.mxu0 %v223_v1 }
   0x4   :  { %9 = vsyncpa [#allocation3], 0  ;;  %v190_v3 = vld [vmem:[%s288_s0] sm:$0xff]   ;;  %vm49_vm1 = vcmask 261120   ;;  %vm94_vm2 = vcmask 130048   ;;  %v225_v14 = vmov 0  }
   0x5   :  { %v160_v4 = vld [vmem:[%s290_s2] ss:$0 sm:$0xff]  ;;  %186 = vset.pattern.permute.xlu0 %v225_v14  ;;  %187 = vset.pattern.permute.xlu1 %v225_v14  ;;  %v118_v26 = vld [vmem:[%s291_s3 + $0x8] sm:$0xff]  ;;  %vm141_vm6 = vcmask 125952   ;;  %s226_s24 = smov [#allocation2]  }
   0x6   :  { %175 = vmatpush3.bf16.msra.mxu0 %v189_v2  ;;  %v117_v13 = vld [vmem:[%s291_s3] sm:$0xff]  ;;  %vm120_vm4 = vcmp.gt.f32.partialorder %v118_v26, 0.0  ;;  %s149_s25 = sshll.u32 %s226_s24, 4  ;;  %s150_s25 = int_to_ptr.vmem [resolvable:$true] %s149_s25 }
   0x7   :  { %vm119_vm3 = vcmp.gt.f32.partialorder %v117_v13, 0.0  ;;  %v122_v27 = vsel %vm120_vm4, 1, %v225_v14  ;;  %s199_s3 = scalar_lea.vmem %s150_s25, 128  ;;  %p204_p1 = scmp.lt.s32.totalorder %s150_s25, %s150_s25 }
   0x8   :  { %v121_v15 = vsel %vm119_vm3, 1, %v225_v14  ;;  %p200_p0 = scmp.ne.s32.totalorder %s150_s25, %s199_s3  ;;  %p205_p2 = scmp.lt.s32.totalorder %s199_s3, %s199_s3 }
   0x9   :  { %177 = vmatmul.mubr.msk.bf16.vlgmr.msra.gmra.mrb[0].mxu0 %vm49_vm1, %v190_v3 }
   0xa   :  { %p206_p3 = por %p205_p2, %p204_p1 }
   0xc   :  { %p207_p4 = pnand %p206_p3, %p200_p0 }
  0xdc   :  { %v87_v5 = vpop.f32.mrb[0].mxu0 }
  0xdd   :  { %v88_v6 = vadd.f32 %v160_v4, %v87_v5  ;;  %v178_v7 = vpop.f32.mrb[1].mxu0 }
  0xde   :  { %v90_v8 = vpop.f32.mrb[2].mxu0 }
  0xdf   :  { %v91_v9 = vadd.f32 %v160_v4, %v90_v8  ;;  %v179_v10 = vpop.f32.mrb[3].mxu0  ;;  %v95_v11 = vsel %vm94_vm2, %v88_v6, -inf }
  0xe0   :  { %96 = vmax.xlane.f32.xlu0 %v95_v11 }
  0xe1   :  { %v98_v12 = vsel %vm94_vm2, %v91_v9, -inf }
  0xe4   :  { %99 = vmax.xlane.f32.xlu0 %v98_v12 }
  0xfa   :  { %124 = vperm.xlu0 %186, %v121_v15  }
 0x16d   :  { %v97_v16 = vpop.xlane.xlu0 %96 }
 0x16e   :  { %v101_v17 = vsub.f32 %v88_v6, %v97_v16 }
 0x170   :  { %v103_v18 = vmul.f32 1.442695, %v101_v17 }
 0x171   :  { %v100_v19 = vpop.xlane.xlu0 %99 }
 0x172   :  { %191 = vpow2.f32 %v103_v18  ;;  %v102_v20 = vsub.f32 %v91_v9, %v100_v19 }
 0x174   :  { %v105_v21 = vmul.f32 1.442695, %v102_v20 }
 0x176   :  { %193 = vpow2.f32 %v105_v21 }
 0x179   :  { %v125_v30 = vpop.permute.xlu0 %124 }
 0x17a   :  { %vm129_vm5 = vcmp.eq.s32.totalorder %v125_v30, 1 }
 0x17c   :  { %v192_v22 = vpop.eup %191 }
 0x17d   :  { %v107_v23 = vsel %vm94_vm2, %v192_v22, 0.0 }
 0x17e   :  { %108 = vadd.xlane.f32.xlu1 %v107_v23 }
 0x180   :  { %v194_v24 = vpop.eup %193 }
 0x181   :  { %v110_v25 = vsel %vm94_vm2, %v194_v24, 0.0 }
 0x182   :  { %111 = vadd.xlane.f32.xlu1 %v110_v25 }
 0x193   :  { %127 = vperm.xlu1 %187, %v122_v27  }
 0x20b   :  { %v109_v28 = vpop.xlane.xlu1 %108 }
 0x20c   :  { %195 = vrcp.f32 %v109_v28 }
 0x20f   :  { %v112_v29 = vpop.xlane.xlu1 %111 }
 0x210   :  { %197 = vrcp.f32 %v112_v29 }
 0x213   :  { %v128_v33 = vpop.permute.xlu1 %127 }
 0x214   :  { %vm130_vm7 = vcmp.eq.s32.totalorder %v128_v33, 1 }
 0x216   :  { %v196_v31 = vpop.eup %195 }
 0x217   :  { %v115_v32 = vmul.f32 %v196_v31, %v192_v22 }
 0x219   :  { %v131_v34 = vsel %vm129_vm5, %v115_v32, 0.0625 }
 0x21a   :  { %v198_v35 = vpop.eup %197  ;;  %v167_v36 = vpack.c.bf16 %v131_v34, %v131_v34 }
 0x21b   :  { %v116_v37 = vmul.f32 %v198_v35, %v194_v24 }
 0x21c   :  { %142 = vst.msk [vmem:[#allocation2] sm:$0xf] %vm141_vm6, %v167_v36 }
 0x21d   :  { %v132_v38 = vsel %vm130_vm7, %v116_v37, 0.0625 }
 0x21e   :  { %v168_v39 = vpack.c.bf16 %v132_v38, %v132_v38 }
 0x220   :  { %143 = vst.msk [vmem:[#allocation2 + $0x4] sm:$0xf] %vm141_vm6, %v168_v39 }
 0x221   :  { %210 = shalt.err (!%p207_p4)
}
 0x222   :  { %s211_s28 = scalar_lea.hbm %s292_s4, 128 }
 0x223   :  { %p212_p5 = scmp.ne.s32.totalorder %s292_s4, %s211_s28  ;;  %p215_p6 = scmp.lt.u32.totalorder %s211_s28, %s292_s4 }
 0x225   :  { %p217_p7 = pnand %p215_p6, %p212_p5 }
 0x227   :  { %220 = shalt.err (!%p217_p7)
}
 0x228   :  { %s227_s7 = smov 64   ;;  %s228_s8 = smov 4  }
 0x229   :  { %155 = dma.vmem_to_hbm [thread:$0]  %s150_s25, 128, %s292_s4, [#allocation3], %s227_s7, %s227_s7, %s228_s8  }
 0x22a   :  { %221 = dma.done.wait [#allocation3], 128  }
 0x22b   :  { %222 = vsyncadd [#allocation3], 4294967168 }
 0x22c   :  { %159 = vsyncpa [#allocation3], 1 }

</bundles_post_ra>
